<compile_context>
chip_gen: v6e
topology: v6e:2x2x1
jax: 0.10.0
libtpu: 0.0.40
codegen_flags: <defaults>
</compile_context>

<pallas_src>
import functools

import jax
import jax.numpy as jnp
from jax.experimental import pallas as pl
from jax.experimental.pallas import tpu as pltpu

EPS = 1e-6


def _round_up(x, m):
    return (x + m - 1) // m * m


def _const_spec(shape, index_map):
    """Grid-invariant operand: single-buffer it (halves its VMEM footprint)."""
    try:
        return pl.BlockSpec(shape, index_map, pipeline_mode=pl.Buffered(1))
    except Exception:  # older jax without pipeline_mode / Buffered
        return pl.BlockSpec(shape, index_map)


def _cap_vmem(need, phys):
    """Requested scoped-VMEM limit: ~25% headroom, capped at 3/4 of physical."""
    return int(min(phys * 3 // 4, max(need * 5 // 4, 32 * 1024 * 1024)))


def _ln_stats(x, d_true):
    """Torch-LayerNorm stats in f32: returns (x - mean, 1 / (std + eps)).

    Assumes padded lanes (>= d_true) of x are zero, so the mean sum needs no
    mask; `diff` is masked so padded lanes never reach the variance.
    torch.std is unbiased (divide by D-1); eps is added to the std.
    """
    dp = x.shape[-1]
    mean = jnp.sum(x, axis=-1, keepdims=True) * (1.0 / d_true)
    diff = x - mean
    if d_true != dp:
        lane = jax.lax.broadcasted_iota(jnp.int32, (1, dp), 1)
        diff = jnp.where(lane < d_true, diff, 0.0)
    var = jnp.sum(diff * diff, axis=-1, keepdims=True) * (1.0 / max(d_true - 1, 1))
    inv = pl.reciprocal(jnp.sqrt(var) + EPS, approx=False)
    return diff, inv


def _encoder_fused_kernel(x_ref, wt1_ref, c1_ref, wt2_ref, c2_ref, o_ref, *, d_true):
    """One row tile of: x1 = x + LN1(x) @ Wt1 + c1 ; out = x1 + LN2(x1) @ Wt2 + c2.

    gamma is pre-folded into the rows of Wt*, c* = beta @ W^T + b (f32).
    Padded lanes of x are zero; padded rows/cols of Wt* and lanes of c* are
    zero, so padded lanes of x1/out stay zero and the LN stats remain exact.
    """
    x = x_ref[...].astype(jnp.float32)

    diff, inv = _ln_stats(x, d_true)
    z1 = jnp.dot((diff * inv).astype(wt1_ref.dtype), wt1_ref[...],
                 preferred_element_type=jnp.float32)
    x1 = x + z1 + c1_ref[...]

    diff, inv = _ln_stats(x1, d_true)
    z2 = jnp.dot((diff * inv).astype(wt2_ref.dtype), wt2_ref[...],
                 preferred_element_type=jnp.float32)
    o_ref[...] = (x1 + z2 + c2_ref[...]).astype(o_ref.dtype)


def _sublayer_ktiled_kernel(x_ref, wt_ref, c_ref, o_ref, y_ref, acc_ref,
                            *, d_true, tk, ksteps):
    """K-tiled single sublayer: out = x + LN(x) @ Wt + c, weight tiled over K."""
    k = pl.program_id(1)

    @pl.when(k == 0)
    def _():
        x = x_ref[...].astype(jnp.float32)
        diff, inv = _ln_stats(x, d_true)
        y = (diff * inv).astype(y_ref.dtype)
        for j in range(ksteps):                        # static unroll
            y_ref[j] = y[:, j * tk:(j + 1) * tk]
        acc_ref[...] = jnp.zeros_like(acc_ref)

    acc_ref[...] += jnp.dot(y_ref[k], wt_ref[...],
                            preferred_element_type=jnp.float32)

    @pl.when(k == pl.num_programs(1) - 1)
    def _():
        o_ref[...] = (x_ref[...].astype(jnp.float32) + acc_ref[...]
                      + c_ref[...]).astype(o_ref.dtype)


@functools.partial(jax.jit, static_argnames=("row_tile", "mxu_dtype", "force_ktiled"))
def encoder_layer(x, w_attn, b_attn, g0, be0, w_ff, b_ff, g1, be1,
                  *, row_tile=256, mxu_dtype=None, force_ktiled=False):
    """EncoderLayer.forward: two fused residual pre-norm sublayers."""
    B, S, D = x.shape
    N = B * S
    Dp = _round_up(D, 128)                       # lane-dense last dim

    # bf16 MXU operands by default (f32 accumulation on the MXU output).
    if mxu_dtype is not None:
        cdt = jnp.dtype(mxu_dtype)
    elif x.dtype == jnp.float32:
        cdt = jnp.dtype(jnp.bfloat16)
    else:
        cdt = jnp.dtype(x.dtype)
    mxub = cdt.itemsize
    xb = jnp.dtype(x.dtype).itemsize

    # Row tile: big (256 default, multiple of 8); prefer a divisor of N so the
    # activation never needs a row-padding copy in HBM.
    rt = _round_up(min(row_tile, _round_up(N, 8)), 8)
    if N % rt != 0:
        for cand in range(rt - 8, max(rt // 2 - 8, 0), -8):
            if cand > 0 and N % cand == 0:
                rt = cand
                break
    Np = _round_up(N, rt)

    # One-time param prep (f32): gamma folded into W^T rows; beta/bias folded
    # into an additive constant c = beta @ W^T + b; pad to Dp; cast W to cdt.
    def prep(w, b, gamma, beta):
        wt = gamma.astype(jnp.float32)[:, None] * w.T.astype(jnp.float32)
        c = beta.astype(jnp.float32) @ w.T.astype(jnp.float32) + b.astype(jnp.float32)
        wt = jnp.pad(wt, ((0, Dp - D), (0, Dp - D))).astype(cdt)
        c = jnp.pad(c, (0, Dp - D)).reshape(1, Dp)
        return wt, c

    wt1, c1 = prep(w_attn, b_attn, g0, be0)
    wt2, c2 = prep(w_ff, b_ff, g1, be1)

    xf = x.reshape(N, D)
    if (Np, Dp) != (N, D):
        xf = jnp.pad(xf, ((0, Np - N), (0, Dp - D)))

    try:
        phys = pltpu.get_tpu_info().vmem_capacity_bytes
    except Exception:  # fall back to the most restrictive per-TC VMEM (v7x)
        phys = 64 * 1024 * 1024

    resident_w = 2 * Dp * Dp * mxub              # both weights, single-buffered
    use_ktiled = force_ktiled or resident_w > phys // 3

    if not use_ktiled:
        # Fused path: both weights resident for the whole grid.
        need = (4 * rt * Dp * xb                 # x + out blocks, double-buffered
                + resident_w                     # two weights (Buffered(1))
                + 4 * Dp * 4                     # c1, c2
                + 8 * rt * Dp * 4)               # kernel f32 temporaries
        out = pl.pallas_call(
            functools.partial(_encoder_fused_kernel, d_true=D),
            out_shape=jax.ShapeDtypeStruct((Np, Dp), x.dtype),
            grid_spec=pltpu.PrefetchScalarGridSpec(
                num_scalar_prefetch=0,
                grid=(Np // rt,),
                in_specs=[
                    pl.BlockSpec((rt, Dp), lambda i: (i, 0)),     # x rows
                    _const_spec((Dp, Dp), lambda i: (0, 0)),      # W_attn^T (resident)
                    _const_spec((1, Dp), lambda i: (0, 0)),       # c1 (f32)
                    _const_spec((Dp, Dp), lambda i: (0, 0)),      # W_ff^T (resident)
                    _const_spec((1, Dp), lambda i: (0, 0)),       # c2 (f32)
                ],
                out_specs=pl.BlockSpec((rt, Dp), lambda i: (i, 0)),
            ),
            compiler_params=pltpu.CompilerParams(
                dimension_semantics=("parallel",),
                vmem_limit_bytes=_cap_vmem(need, phys),
            ),
        )(xf, wt1, c1, wt2, c2)
    else:
        # K-tiled fallback (large D, e.g. v7x): weight streamed over K blocks,
        # f32 accumulator scratch, two pallas_calls (LN2 needs the full x1 row).
        tk = 128
        for cand in (512, 256):
            if Dp % cand == 0 and Dp // cand >= 2:
                tk = cand
                break
        ksteps = Dp // tk
        need = (4 * rt * Dp * xb                 # x + out blocks
                + 2 * tk * Dp * mxub             # weight K-block, double-buffered
                + 2 * Dp * 4                     # c
                + rt * Dp * (mxub + 4)           # y + acc scratch
                + 6 * rt * Dp * 4)               # kernel f32 temporaries
        vlim = _cap_vmem(need, phys)

        def sublayer(xin, wt, c):
            return pl.pallas_call(
                functools.partial(_sublayer_ktiled_kernel, d_true=D,
                                  tk=tk, ksteps=ksteps),
                out_shape=jax.ShapeDtypeStruct((Np, Dp), x.dtype),
                grid_spec=pltpu.PrefetchScalarGridSpec(
                    num_scalar_prefetch=0,
                    grid=(Np // rt, ksteps),
                    in_specs=[
                        pl.BlockSpec((rt, Dp), lambda i, k: (i, 0)),   # x rows
                        pl.BlockSpec((tk, Dp), lambda i, k: (k, 0)),   # W^T K-block
                        _const_spec((1, Dp), lambda i, k: (0, 0)),     # c (f32)
                    ],
                    out_specs=pl.BlockSpec((rt, Dp), lambda i, k: (i, 0)),
                    scratch_shapes=[
                        pltpu.VMEM((ksteps, rt, tk), cdt),      # normalized rows
                        pltpu.VMEM((rt, Dp), jnp.float32),      # accumulator
                    ],
                ),
                compiler_params=pltpu.CompilerParams(
                    dimension_semantics=("parallel", "arbitrary"),
                    vmem_limit_bytes=vlim,
                ),
            )(xin, wt, c)

        out = sublayer(xf, wt1, c1)
        out = sublayer(out, wt2, c2)

    return out[:N, :D].reshape(B, S, D)


# ----------------------------- pure-JAX reference ----------------------------

def _sublayer_ref(x, w, b, gamma, beta):
    xf = x.astype(jnp.float32)
    mean = jnp.mean(xf, axis=-1, keepdims=True)
    diff = xf - mean
    std = jnp.sqrt(jnp.sum(diff * diff, axis=-1, keepdims=True)
                   / max(x.shape[-1] - 1, 1))
    y = gamma * diff / (std + EPS) + beta
    z = y @ w.T + b
    return (xf + z).astype(x.dtype)


def encoder_layer_ref(x, w_attn, b_attn, g0, be0, w_ff, b_ff, g1, be1):
    x = _sublayer_ref(x, w_attn, b_attn, g0, be0)
    return _sublayer_ref(x, w_ff, b_ff, g1, be1)


if __name__ == "__main__":
    def make_inputs(key, B, S, D):
        ks = jax.random.split(key, 9)
        x = jax.random.normal(ks[0], (B, S, D), jnp.float32)
        # Deterministic Linear(D, D) stand-ins for the injected sublayers.
        w_attn = jax.random.normal(ks[1], (D, D), jnp.float32) * (1.0 / jnp.sqrt(D))
        b_attn = jax.random.normal(ks[2], (D,), jnp.float32) * 0.01
        w_ff = jax.random.normal(ks[3], (D, D), jnp.float32) * (1.0 / jnp.sqrt(D))
        b_ff = jax.random.normal(ks[4], (D,), jnp.float32) * 0.01
        # LayerNorm params (a_2 ~ 1, b_2 ~ 0, perturbed to exercise the folding).
        g0 = 1.0 + 0.1 * jax.random.normal(ks[5], (D,), jnp.float32)
        be0 = 0.1 * jax.random.normal(ks[6], (D,), jnp.float32)
        g1 = 1.0 + 0.1 * jax.random.normal(ks[7], (D,), jnp.float32)
        be1 = 0.1 * jax.random.normal(ks[8], (D,), jnp.float32)
        return (x, w_attn, b_attn, g0, be0, w_ff, b_ff, g1, be1)

    # 1) Fused resident-weight path (the default).
    args = make_inputs(jax.random.PRNGKey(0), 2, 8, 32)
    out = jax.block_until_ready(encoder_layer(*args))
    ref = encoder_layer_ref(*args)
    assert out.shape == (2, 8, 32)
    err = float(jnp.max(jnp.abs(out - ref)))
    # Tolerance covers bf16 MXU operands (f32 accumulation).
    assert jnp.allclose(out, ref, atol=1e-1, rtol=5e-2), f"max abs err = {err}"

    # 2) K-tiled fallback path (used when the resident weights exceed ~1/3 of
    #    the per-generation VMEM budget, e.g. large D on v7x).
    args2 = make_inputs(jax.random.PRNGKey(1), 2, 64, 256)
    out2 = jax.block_until_ready(encoder_layer(*args2, force_ktiled=True))
    ref2 = encoder_layer_ref(*args2)
    assert out2.shape == (2, 64, 256)
    err2 = float(jnp.max(jnp.abs(out2 - ref2)))
    assert jnp.allclose(out2, ref2, atol=1e-1, rtol=5e-2), f"max abs err = {err2}"

    print("KERNEL_OK")
</pallas_src>

<mosaic_0001>
module attributes {stable_mosaic.version = 11 : i64} {
  func.func @_encoder_fused_kernel(%arg0: i32, %arg1: memref<16x128xf32, #tpu.memory_space<vmem>>, %arg2: memref<128x128xbf16, #tpu.memory_space<vmem>>, %arg3: memref<1x128xf32, #tpu.memory_space<vmem>>, %arg4: memref<128x128xbf16, #tpu.memory_space<vmem>>, %arg5: memref<1x128xf32, #tpu.memory_space<vmem>>, %arg6: memref<16x128xf32, #tpu.memory_space<vmem>>) attributes {dimension_semantics = [#tpu.dimension_semantics<parallel>], iteration_bounds = array<i64: 1>, scalar_prefetch = 0 : i64, scratch_operands = 0 : i64, tpu.core_type = #tpu.core_type<tc>, window_params = [{transform_indices = @transform_0, window_bounds = array<i64: 16, 128>}, {pipeline_mode = #tpu.pipeline_mode<synchronous>, transform_indices = @transform_1, window_bounds = array<i64: 128, 128>}, {pipeline_mode = #tpu.pipeline_mode<synchronous>, transform_indices = @transform_2, window_bounds = array<i64: 1, 128>}, {pipeline_mode = #tpu.pipeline_mode<synchronous>, transform_indices = @transform_3, window_bounds = array<i64: 128, 128>}, {pipeline_mode = #tpu.pipeline_mode<synchronous>, transform_indices = @transform_4, window_bounds = array<i64: 1, 128>}, {transform_indices = @transform_5, window_bounds = array<i64: 16, 128>}]} {
    %c0 = arith.constant 0 : index
    %c0_0 = arith.constant 0 : index
    %0 = vector.load %arg1[%c0, %c0_0] : memref<16x128xf32, #tpu.memory_space<vmem>>, vector<16x128xf32>
    %cst = arith.constant dense<0.000000e+00> : vector<16xf32>
    %1 = vector.multi_reduction <add>, %0, %cst [1] : vector<16x128xf32> to vector<16xf32>
    %2 = vector.shape_cast %1 : vector<16xf32> to vector<16x1xf32>
    %cst_1 = arith.constant 3.125000e-02 : f32
    %3 = vector.broadcast %cst_1 : f32 to vector<16x1xf32>
    %4 = arith.mulf %2, %3 : vector<16x1xf32>
    %5 = vector.broadcast %4 : vector<16x1xf32> to vector<16x128xf32>
    %6 = arith.subf %0, %5 : vector<16x128xf32>
    %7 = tpu.iota {dimensions = array<i32: 1>} : vector<1x128xi32>
    %c32_i32 = arith.constant 32 : i32
    %8 = vector.broadcast %c32_i32 : i32 to vector<1x128xi32>
    %9 = arith.cmpi slt, %7, %8 : vector<1x128xi32>
    %cst_2 = arith.constant 0.000000e+00 : f32
    %10 = vector.shape_cast %9 : vector<1x128xi1> to vector<1x128xi1>
    %11 = vector.broadcast %10 : vector<1x128xi1> to vector<16x128xi1>
    %12 = vector.broadcast %cst_2 : f32 to vector<16x128xf32>
    %13 = arith.select %11, %6, %12 : vector<16x128xi1>, vector<16x128xf32>
    %14 = arith.mulf %13, %13 : vector<16x128xf32>
    %cst_3 = arith.constant dense<0.000000e+00> : vector<16xf32>
    %15 = vector.multi_reduction <add>, %14, %cst_3 [1] : vector<16x128xf32> to vector<16xf32>
    %16 = vector.shape_cast %15 : vector<16xf32> to vector<16x1xf32>
    %cst_4 = arith.constant 0.0322580636 : f32
    %17 = vector.broadcast %cst_4 : f32 to vector<16x1xf32>
    %18 = arith.mulf %16, %17 : vector<16x1xf32>
    %19 = math.sqrt %18 : vector<16x1xf32>
    %cst_5 = arith.constant 9.99999997E-7 : f32
    %20 = vector.broadcast %cst_5 : f32 to vector<16x1xf32>
    %21 = arith.addf %19, %20 : vector<16x1xf32>
    %22 = tpu.reciprocal %21 : vector<16x1xf32> -> vector<16x1xf32>
    %23 = vector.broadcast %22 : vector<16x1xf32> to vector<16x128xf32>
    %24 = arith.mulf %13, %23 : vector<16x128xf32>
    %25 = arith.truncf %24 : vector<16x128xf32> to vector<16x128xbf16>
    %c0_6 = arith.constant 0 : index
    %c0_7 = arith.constant 0 : index
    %26 = vector.load %arg2[%c0_6, %c0_7] : memref<128x128xbf16, #tpu.memory_space<vmem>>, vector<128x128xbf16>
    %cst_8 = arith.constant dense<0.000000e+00> : vector<16x128xf32>
    %27 = tpu.matmul %25, %26, %cst_8 {dimension_numbers = #tpu.dot_dimension_numbers<[1], [0], [0], [1], [0, 0, 1, 1], [], []>} : vector<16x128xbf16>, vector<128x128xbf16>, vector<16x128xf32> -> vector<16x128xf32>
    %28 = arith.addf %0, %27 : vector<16x128xf32>
    %c0_9 = arith.constant 0 : index
    %c0_10 = arith.constant 0 : index
    %29 = vector.load %arg3[%c0_9, %c0_10] : memref<1x128xf32, #tpu.memory_space<vmem>>, vector<1x128xf32>
    %30 = vector.broadcast %29 : vector<1x128xf32> to vector<16x128xf32>
    %31 = arith.addf %28, %30 : vector<16x128xf32>
    %cst_11 = arith.constant dense<0.000000e+00> : vector<16xf32>
    %32 = vector.multi_reduction <add>, %31, %cst_11 [1] : vector<16x128xf32> to vector<16xf32>
    %33 = vector.shape_cast %32 : vector<16xf32> to vector<16x1xf32>
    %cst_12 = arith.constant 3.125000e-02 : f32
    %34 = vector.broadcast %cst_12 : f32 to vector<16x1xf32>
    %35 = arith.mulf %33, %34 : vector<16x1xf32>
    %36 = vector.broadcast %35 : vector<16x1xf32> to vector<16x128xf32>
    %37 = arith.subf %31, %36 : vector<16x128xf32>
    %38 = tpu.iota {dimensions = array<i32: 1>} : vector<1x128xi32>
    %c32_i32_13 = arith.constant 32 : i32
    %39 = vector.broadcast %c32_i32_13 : i32 to vector<1x128xi32>
    %40 = arith.cmpi slt, %38, %39 : vector<1x128xi32>
    %cst_14 = arith.constant 0.000000e+00 : f32
    %41 = vector.shape_cast %40 : vector<1x128xi1> to vector<1x128xi1>
    %42 = vector.broadcast %41 : vector<1x128xi1> to vector<16x128xi1>
    %43 = vector.broadcast %cst_14 : f32 to vector<16x128xf32>
    %44 = arith.select %42, %37, %43 : vector<16x128xi1>, vector<16x128xf32>
    %45 = arith.mulf %44, %44 : vector<16x128xf32>
    %cst_15 = arith.constant dense<0.000000e+00> : vector<16xf32>
    %46 = vector.multi_reduction <add>, %45, %cst_15 [1] : vector<16x128xf32> to vector<16xf32>
    %47 = vector.shape_cast %46 : vector<16xf32> to vector<16x1xf32>
    %cst_16 = arith.constant 0.0322580636 : f32
    %48 = vector.broadcast %cst_16 : f32 to vector<16x1xf32>
    %49 = arith.mulf %47, %48 : vector<16x1xf32>
    %50 = math.sqrt %49 : vector<16x1xf32>
    %cst_17 = arith.constant 9.99999997E-7 : f32
    %51 = vector.broadcast %cst_17 : f32 to vector<16x1xf32>
    %52 = arith.addf %50, %51 : vector<16x1xf32>
    %53 = tpu.reciprocal %52 : vector<16x1xf32> -> vector<16x1xf32>
    %54 = vector.broadcast %53 : vector<16x1xf32> to vector<16x128xf32>
    %55 = arith.mulf %44, %54 : vector<16x128xf32>
    %56 = arith.truncf %55 : vector<16x128xf32> to vector<16x128xbf16>
    %c0_18 = arith.constant 0 : index
    %c0_19 = arith.constant 0 : index
    %57 = vector.load %arg4[%c0_18, %c0_19] : memref<128x128xbf16, #tpu.memory_space<vmem>>, vector<128x128xbf16>
    %cst_20 = arith.constant dense<0.000000e+00> : vector<16x128xf32>
    %58 = tpu.matmul %56, %57, %cst_20 {dimension_numbers = #tpu.dot_dimension_numbers<[1], [0], [0], [1], [0, 0, 1, 1], [], []>} : vector<16x128xbf16>, vector<128x128xbf16>, vector<16x128xf32> -> vector<16x128xf32>
    %59 = arith.addf %31, %58 : vector<16x128xf32>
    %c0_21 = arith.constant 0 : index
    %c0_22 = arith.constant 0 : index
    %60 = vector.load %arg5[%c0_21, %c0_22] : memref<1x128xf32, #tpu.memory_space<vmem>>, vector<1x128xf32>
    %61 = vector.broadcast %60 : vector<1x128xf32> to vector<16x128xf32>
    %62 = arith.addf %59, %61 : vector<16x128xf32>
    %c0_23 = arith.constant 0 : index
    %c0_24 = arith.constant 0 : index
    %63 = vector.load %arg6[%c0_23, %c0_24] : memref<16x128xf32, #tpu.memory_space<vmem>>, vector<16x128xf32>
    tpu.vector_store %arg6[%c0_23, %c0_24], %62 {strides = array<i32>} : memref<16x128xf32, #tpu.memory_space<vmem>>, vector<16x128xf32>,
    return
  }
  func.func @transform_0(%arg0: i32) -> (i32, i32) {
    %c0_i32 = arith.constant 0 : i32
    %c0_i32_0 = arith.constant 0 : i32
    return %arg0, %c0_i32 : i32, i32
  }
  func.func @transform_1(%arg0: i32) -> (i32, i32) {
    %c0_i32 = arith.constant 0 : i32
    %c0_i32_0 = arith.constant 0 : i32
    %c0_i32_1 = arith.constant 0 : i32
    return %c0_i32, %c0_i32_0 : i32, i32
  }
  func.func @transform_2(%arg0: i32) -> (i32, i32) {
    %c0_i32 = arith.constant 0 : i32
    %c0_i32_0 = arith.constant 0 : i32
    %c0_i32_1 = arith.constant 0 : i32
    return %c0_i32, %c0_i32_0 : i32, i32
  }
  func.func @transform_3(%arg0: i32) -> (i32, i32) {
    %c0_i32 = arith.constant 0 : i32
    %c0_i32_0 = arith.constant 0 : i32
    %c0_i32_1 = arith.constant 0 : i32
    return %c0_i32, %c0_i32_0 : i32, i32
  }
  func.func @transform_4(%arg0: i32) -> (i32, i32) {
    %c0_i32 = arith.constant 0 : i32
    %c0_i32_0 = arith.constant 0 : i32
    %c0_i32_1 = arith.constant 0 : i32
    return %c0_i32, %c0_i32_0 : i32, i32
  }
  func.func @transform_5(%arg0: i32) -> (i32, i32) {
    %c0_i32 = arith.constant 0 : i32
    %c0_i32_0 = arith.constant 0 : i32
    return %arg0, %c0_i32 : i32, i32
  }
}

</mosaic_0001>

<bundles_post_ra>
// kernel: encoder_layer.1
= control target key start
LH: loop header
LB: loop body
LE: loop exit
PB: predicated region body
PF: predicated region fallthrough
CT: control target
= control target key end

     0   :  { %v31_v2 = vlaneseq  ;;  %v454_v15 = vmov 0.0   ;;  %vm455_vm1 = vmmov 0   ;;  %s606_s0 = inlined_call_operand.vmem [shape: f32[16,128], index: 0, kind: input, shape index: {}]   ;;  %s607_s1 = inlined_call_operand.vmem [shape: bf16[128,128], index: 1, kind: input, shape index: {}]   ;;  %s608_s2 = inlined_call_operand.vmem [shape: f32[1,128], index: 2, kind: input, shape index: {}]   ;;  %s609_s3 = inlined_call_operand.vmem [shape: bf16[128,128], index: 3, kind: input, shape index: {}]   ;;  %s610_s4 = inlined_call_operand.vmem [shape: f32[1,128], index: 4, kind: input, shape index: {}]   ;;  %s611_s5 = inlined_call_operand.vmem [shape: f32[16,128], index: 5, kind: output, shape index: {}]  }
   0x1   :  { %v489_v0 = vld [vmem:[%s606_s0] sm:$0xff]  ;;  %v495_v1 = vld [vmem:[%s606_s0 + $0x8] sm:$0xff]  ;;  %v422_v14 = vld [vmem:[%s607_s1 + $0x38] sm:$0xff]   ;;  %380 = vmatprep.subr.bf16.mxu0 %v454_v15  ;;  %400 = vmatprep.subr.bf16.mxu1 %v454_v15 }
   0x2   :  { %23 = vadd.xlane.f32.xlu0 %v489_v0  ;;  %v498_v3 = vand.u32 127, %v31_v2  ;;  %381 = vmatpush3.bf16.msra.mxu0 %v422_v14  ;;  %v423_v16 = vld [vmem:[%s607_s1 + $0x30] sm:$0xff]   ;;  %v424_v17 = vld [vmem:[%s607_s1 + $0x28] sm:$0xff]   ;;  %v425_v18 = vld [vmem:[%s607_s1 + $0x20] sm:$0xff]  }
   0x3   :  { %382 = vmatprep.subr.bf16.mxu0 %v454_v15  ;;  %396 = vmatprep.mubr.msk.bf16.mxu0 %vm455_vm1, %v454_v15  ;;  %v426_v19 = vld [vmem:[%s607_s1 + $0x18] sm:$0xff]   ;;  %v427_v20 = vld [vmem:[%s607_s1 + $0x10] sm:$0xff]   ;;  %v428_v21 = vld [vmem:[%s607_s1 + $0x8] sm:$0xff]  }
   0x4   :  { %vm33_vm0 = vcmp.lt.s32.totalorder %v498_v3, 32  ;;  %416 = vmatprep.mubr.msk.bf16.mxu1 %vm455_vm1, %v454_v15  ;;  %v429_v22 = vld [vmem:[%s607_s1] sm:$0xff]   ;;  %v430_v63 = vld [vmem:[%s609_s3 + $0x38] sm:$0xff]  }
   0x5   :  { %v352_v45 = vld [vmem:[%s608_s2] ss:$0 sm:$0xff]  ;;  %401 = vmatpush3.bf16.msra.mxu1 %v430_v63  ;;  %v434_v3 = vld [vmem:[%s609_s3 + $0x18] sm:$0xff]  }
   0x6   :  { %25 = vadd.xlane.f32.xlu0 %v495_v1  ;;  %383 = vmatpush3.bf16.msra.mxu0 %v423_v16  ;;  %v433_v2 = vld [vmem:[%s609_s3 + $0x20] sm:$0xff]  }
   0x7   :  { %384 = vmatprep.subr.bf16.mxu0 %v454_v15  ;;  %402 = vmatprep.subr.bf16.mxu1 %v454_v15 }
   0xa   :  { %385 = vmatpush3.bf16.msra.mxu0 %v424_v17 }
   0xb   :  { %386 = vmatprep.subr.bf16.mxu0 %v454_v15 }
   0xe   :  { %387 = vmatpush3.bf16.msra.mxu0 %v425_v18 }
   0xf   :  { %388 = vmatprep.subr.bf16.mxu0 %v454_v15 }
  0x12   :  { %389 = vmatpush3.bf16.msra.mxu0 %v426_v19 }
  0x13   :  { %390 = vmatprep.subr.bf16.mxu0 %v454_v15 }
  0x16   :  { %391 = vmatpush3.bf16.msra.mxu0 %v427_v20 }
  0x17   :  { %392 = vmatprep.subr.bf16.mxu0 %v454_v15 }
  0x1a   :  { %393 = vmatpush3.bf16.msra.mxu0 %v428_v21 }
  0x1b   :  { %394 = vmatprep.subr.bf16.mxu0 %v454_v15 }
  0x1e   :  { %395 = vmatpush3.bf16.msra.mxu0 %v429_v22 }
  0x8b   :  { %v24_v4 = vpop.xlane.xlu0 %23 }
  0x8c   :  { %v27_v5 = vmul.f32 0.03125, %v24_v4  ;;  %v435_v4 = vld [vmem:[%s609_s3 + $0x10] sm:$0xff]  }
  0x8e   :  { %v29_v6 = vsub.f32 %v489_v0, %v27_v5  ;;  %v436_v5 = vld [vmem:[%s609_s3 + $0x8] sm:$0xff]  }
  0x8f   :  { %v26_v7 = vpop.xlane.xlu0 %25 }
  0x90   :  { %v28_v8 = vmul.f32 0.03125, %v26_v7  ;;  %v504_v9 = vsel %vm33_vm0, %v29_v6, 0.0  ;;  %v437_v6 = vld [vmem:[%s609_s3] sm:$0xff]  }
  0x91   :  { %v38_v10 = vmul.f32 %v504_v9, %v504_v9 }
  0x92   :  { %v30_v11 = vsub.f32 %v495_v1, %v28_v8 }
  0x93   :  { %40 = vadd.xlane.f32.xlu1 %v38_v10 }
  0x94   :  { %v37_v12 = vsel %vm33_vm0, %v30_v11, 0.0 }
  0x95   :  { %v39_v13 = vmul.f32 %v37_v12, %v37_v12 }
  0x97   :  { %42 = vadd.xlane.f32.xlu1 %v39_v13 }
 0x11c   :  { %v41_v23 = vpop.xlane.xlu1 %40 }
 0x11d   :  { %v44_v24 = vmul.f32 0.032258064, %v41_v23 }
 0x11f   :  { %438 = vrsqrt.f32 %v44_v24  ;;  %vm48_vm2 = vcmp.eq.f32.partialorder %v44_v24, inf  ;;  %v51_v29 = vand.u32 2147483648, %v44_v24  ;;  %vm50_vm3 = vcmp.eq.f32.partialorder %v44_v24, 0.0 }
 0x120   :  { %v43_v25 = vpop.xlane.xlu1 %42 }
 0x121   :  { %v45_v26 = vmul.f32 0.032258064, %v43_v25 }
 0x123   :  { %440 = vrsqrt.f32 %v45_v26  ;;  %vm55_vm4 = vcmp.eq.f32.partialorder %v45_v26, inf  ;;  %v58_v35 = vand.u32 2147483648, %v45_v26  ;;  %vm57_vm5 = vcmp.eq.f32.partialorder %v45_v26, 0.0 }
 0x12c   :  { %v439_v27 = vpop.eup %438 }
 0x12d   :  { %v47_v28 = vmul.f32 %v439_v27, %v44_v24 }
 0x12f   :  { %v49_v30 = vsel %vm48_vm2, %v44_v24, %v47_v28 }
 0x130   :  { %v441_v31 = vpop.eup %440  ;;  %v52_v32 = vsel %vm50_vm3, %v51_v29, %v49_v30  ;;  %v361_v29 = vld [vmem:[%s610_s4] ss:$0 sm:$0xff] }
 0x131   :  { %v54_v33 = vmul.f32 %v441_v31, %v45_v26  ;;  %v60_v34 = vadd.f32 1e-06, %v52_v32 }
 0x133   :  { %v56_v36 = vsel %vm55_vm4, %v45_v26, %v54_v33  ;;  %442 = vrcp.f32 %v60_v34 }
 0x134   :  { %v59_v37 = vsel %vm57_vm5, %v58_v35, %v56_v36 }
 0x135   :  { %v61_v38 = vadd.f32 1e-06, %v59_v37 }
 0x137   :  { %444 = vrcp.f32 %v61_v38 }
 0x140   :  { %v443_v39 = vpop.eup %442 }
 0x141   :  { %v64_v41 = vmul.f32 %v443_v39, %v504_v9 }
 0x144   :  { %v445_v40 = vpop.eup %444 }
 0x145   :  { %v65_v42 = vmul.f32 %v445_v40, %v37_v12 }
 0x147   :  { %v66_v43 = vpack.c.bf16 %v65_v42, %v64_v41 }
 0x149   :  { %397 = vmatmul.mubr.bf16.vlgmr.msra.gmra.mxu0 %v66_v43 }
 0x209   :  { %v165_v44 = vpop.f32.mrf.mxu0 }
 0x20a   :  { %v172_v46 = vadd.f32 %v165_v44, %v489_v0  ;;  %v431_v0 = vld [vmem:[%s609_s3 + $0x30] sm:$0xff]  }
 0x20b   :  { %v398_v47 = vpop.f32.mrf.mxu0  ;;  %403 = vmatpush3.bf16.msra.mxu1 %v431_v0 }
 0x20c   :  { %v551_v48 = vadd.f32 %v352_v45, %v172_v46  ;;  %404 = vmatprep.subr.bf16.mxu1 %v454_v15 }
 0x20d   :  { %v168_v49 = vpop.f32.mrf.mxu0 }
 0x20e   :  { %v173_v50 = vadd.f32 %v168_v49, %v495_v1  ;;  %183 = vadd.xlane.f32.xlu0 %v551_v48  ;;  %v432_v1 = vld [vmem:[%s609_s3 + $0x28] sm:$0xff]  }
 0x20f   :  { %v399_v51 = vpop.f32.mrf.mxu0  ;;  %405 = vmatpush3.bf16.msra.mxu1 %v432_v1 }
 0x210   :  { %v555_v52 = vadd.f32 %v352_v45, %v173_v50  ;;  %406 = vmatprep.subr.bf16.mxu1 %v454_v15 }
 0x212   :  { %185 = vadd.xlane.f32.xlu1 %v555_v52 }
 0x213   :  { %407 = vmatpush3.bf16.msra.mxu1 %v433_v2 }
 0x214   :  { %408 = vmatprep.subr.bf16.mxu1 %v454_v15 }
 0x217   :  { %409 = vmatpush3.bf16.msra.mxu1 %v434_v3 }
 0x218   :  { %410 = vmatprep.subr.bf16.mxu1 %v454_v15 }
 0x21b   :  { %411 = vmatpush3.bf16.msra.mxu1 %v435_v4 }
 0x21c   :  { %412 = vmatprep.subr.bf16.mxu1 %v454_v15 }
 0x21f   :  { %413 = vmatpush3.bf16.msra.mxu1 %v436_v5 }
 0x220   :  { %414 = vmatprep.subr.bf16.mxu1 %v454_v15 }
 0x223   :  { %415 = vmatpush3.bf16.msra.mxu1 %v437_v6 }
 0x297   :  { %v184_v53 = vpop.xlane.xlu0 %183 }
 0x298   :  { %v187_v54 = vmul.f32 0.03125, %v184_v53 }
 0x29a   :  { %v189_v55 = vsub.f32 %v551_v48, %v187_v54 }
 0x29b   :  { %v186_v56 = vpop.xlane.xlu1 %185 }
 0x29c   :  { %v188_v57 = vmul.f32 0.03125, %v186_v56  ;;  %v191_v58 = vsel %vm33_vm0, %v189_v55, 0.0 }
 0x29d   :  { %v193_v59 = vmul.f32 %v191_v58, %v191_v58 }
 0x29e   :  { %v190_v60 = vsub.f32 %v555_v52, %v188_v57 }
 0x29f   :  { %195 = vadd.xlane.f32.xlu0 %v193_v59 }
 0x2a0   :  { %v192_v61 = vsel %vm33_vm0, %v190_v60, 0.0 }
 0x2a1   :  { %v194_v62 = vmul.f32 %v192_v61, %v192_v61 }
 0x2a3   :  { %197 = vadd.xlane.f32.xlu1 %v194_v62 }
 0x328   :  { %v196_v7 = vpop.xlane.xlu0 %195 }
 0x329   :  { %v199_v8 = vmul.f32 0.032258064, %v196_v7 }
 0x32b   :  { %446 = vrsqrt.f32 %v199_v8  ;;  %vm203_vm6 = vcmp.eq.f32.partialorder %v199_v8, inf  ;;  %v206_v13 = vand.u32 2147483648, %v199_v8  ;;  %vm205_vm7 = vcmp.eq.f32.partialorder %v199_v8, 0.0 }
 0x32c   :  { %v198_v9 = vpop.xlane.xlu1 %197 }
 0x32d   :  { %v200_v10 = vmul.f32 0.032258064, %v198_v9 }
 0x32f   :  { %448 = vrsqrt.f32 %v200_v10  ;;  %vm210_vm8 = vcmp.eq.f32.partialorder %v200_v10, inf  ;;  %v213_v20 = vand.u32 2147483648, %v200_v10  ;;  %vm212_vm9 = vcmp.eq.f32.partialorder %v200_v10, 0.0 }
 0x338   :  { %v447_v11 = vpop.eup %446 }
 0x339   :  { %v202_v12 = vmul.f32 %v447_v11, %v199_v8 }
 0x33b   :  { %v204_v14 = vsel %vm203_vm6, %v199_v8, %v202_v12 }
 0x33c   :  { %v449_v16 = vpop.eup %448  ;;  %v207_v17 = vsel %vm205_vm7, %v206_v13, %v204_v14 }
 0x33d   :  { %v215_v18 = vadd.f32 1e-06, %v207_v17  ;;  %v209_v19 = vmul.f32 %v449_v16, %v200_v10 }
 0x33f   :  { %v211_v15 = vsel %vm210_vm8, %v200_v10, %v209_v19  ;;  %450 = vrcp.f32 %v215_v18 }
 0x340   :  { %v214_v21 = vsel %vm212_vm9, %v213_v20, %v211_v15 }
 0x341   :  { %v216_v22 = vadd.f32 1e-06, %v214_v21 }
 0x343   :  { %452 = vrcp.f32 %v216_v22 }
 0x34c   :  { %v451_v23 = vpop.eup %450 }
 0x34d   :  { %v219_v25 = vmul.f32 %v451_v23, %v191_v58 }
 0x350   :  { %v453_v24 = vpop.eup %452 }
 0x351   :  { %v220_v26 = vmul.f32 %v453_v24, %v192_v61 }
 0x353   :  { %v221_v27 = vpack.c.bf16 %v220_v26, %v219_v25 }
 0x355   :  { %417 = vmatmul.mubr.bf16.vlgmr.msra.gmra.mxu1 %v221_v27 }
 0x415   :  { %v320_v28 = vpop.f32.mrf.mxu1 }
 0x416   :  { %v327_v30 = vadd.f32 %v320_v28, %v551_v48 }
 0x417   :  { %v418_v31 = vpop.f32.mrf.mxu1 }
 0x418   :  { %v336_v32 = vadd.f32 %v361_v29, %v327_v30 }
 0x419   :  { %v323_v33 = vpop.f32.mrf.mxu1 }
 0x41a   :  { %338 = vst [vmem:[%s611_s5] sm:$0xff] %v336_v32  ;;  %v328_v34 = vadd.f32 %v323_v33, %v555_v52 }
 0x41b   :  { %v419_v35 = vpop.f32.mrf.mxu1 }
 0x41c   :  { %v337_v36 = vadd.f32 %v361_v29, %v328_v34 }
 0x41e   :  { %339 = vst [vmem:[%s611_s5 + $0x8] sm:$0xff] %v337_v36 }

</bundles_post_ra>
